<compile_context>
chip_gen: v7x
topology: tpu7x:2x2x1
jax: 0.10.0
libtpu: 0.0.40
codegen_flags: <defaults>
</compile_context>

<pallas_src>
import functools

import jax
import jax.numpy as jnp
from jax.experimental import pallas as pl
from jax.experimental.pallas import tpu as pltpu

NEG_SLOPE = 0.01   # PyTorch nn.LeakyReLU default
LANE = 128         # TPU lane width
TM_MAX = 1024      # max rows per batch tile


def _leaky_relu(x, slope=NEG_SLOPE):
    return jnp.where(x > 0, x, slope * x)


def _mlp_chain(h, w_refs, b_ref):
    """Run one activation block through all layers. bf16 operands, f32 MXU
    accumulation, f32 bias + LeakyReLU epilogue. Returns f32 logits."""
    n = len(w_refs)
    for li in range(n - 1):
        w = w_refs[li][...]
        d = w.shape[1]
        z = jnp.dot(h, w, preferred_element_type=jnp.float32) + b_ref[li:li + 1, :d]
        h = _leaky_relu(z).astype(jnp.bfloat16)
    w = w_refs[n - 1][...]
    d = w.shape[1]
    return jnp.dot(h, w, preferred_element_type=jnp.float32) + b_ref[n - 1:n, :d]


def soft_q_mlp_kernel(x_ref, w1_ref, w2_ref, w3_ref, w4_ref, w5_ref, b_ref, out_ref):
    """One batch tile. Weights/bias refs are VMEM-resident across grid steps.
    Large tiles are split into two independent half-tile chains so the MXU has
    work while the other half's VPU epilogue runs (v5e/v6e MRF occupancy)."""
    w_refs = (w1_ref, w2_ref, w3_ref, w4_ref, w5_ref)
    tm = x_ref.shape[0]
    if tm >= 256 and tm % 32 == 0:
        half = tm // 2
        out_ref[0:half, :] = _mlp_chain(x_ref[0:half, :], w_refs, b_ref)
        out_ref[half:tm, :] = _mlp_chain(x_ref[half:tm, :], w_refs, b_ref)
    else:
        out_ref[...] = _mlp_chain(x_ref[...], w_refs, b_ref)


def pack_params(params, lane=LANE):
    """params: list of (W (in,out) f32, b (out,) f32).

    Returns (weights_bf16, bias_blob_f32):
      * every layer's in/out dims zero-padded to a multiple of `lane`
        (input 16->128, hidden 64->128, final out->128) so all kernel tensors
        are lane-dense; weights cast to bf16,
      * biases (kept f32) zero-padded and stacked into one (n_layers, 512) array.
    Zero padding is exact: padded input cols x padded weight rows contribute 0,
    padded output lanes get 0 bias and LeakyReLU(0)=0, and are sliced away.
    """
    weights, biases = [], []
    prev_out_pad = None
    for i, (w, b) in enumerate(params):
        w = jnp.asarray(w, jnp.float32)
        b = jnp.asarray(b, jnp.float32).reshape(-1)
        fan_in, fan_out = w.shape
        in_pad = (lane * pl.cdiv(fan_in, lane)) if i == 0 else prev_out_pad
        out_pad = lane * pl.cdiv(fan_out, lane)
        w = jnp.pad(w, ((0, in_pad - fan_in), (0, out_pad - fan_out)))
        b = jnp.pad(b, (0, out_pad - fan_out))
        weights.append(w.astype(jnp.bfloat16))
        biases.append(b)
        prev_out_pad = out_pad
    max_w = max(bb.shape[0] for bb in biases)
    bias_blob = jnp.stack([jnp.pad(bb, (0, max_w - bb.shape[0])) for bb in biases])
    return weights, bias_blob


def _choose_tm(batch):
    """Adaptive batch tile: exact (16-rounded) for small batches, ~half the
    rows (>= 2 grid steps for v7x's two TensorCores) capped at TM_MAX for
    large batches. Always a multiple of 16 (bf16 sublane packing)."""
    rows = 16 * pl.cdiv(max(batch, 1), 16)
    if rows < 512:
        return rows
    return min(TM_MAX, 32 * pl.cdiv(rows, 64))   # ~rows/2, rounded up to 32


@functools.partial(jax.jit, static_argnames=("tm",))
def _soft_q_forward_padded(x_padded, weights, bias_blob, *, tm):
    padded_batch, in_pad = x_padded.shape
    out_pad = weights[-1].shape[1]
    grid = (padded_batch // tm,)

    # Batch tile streams; weights/bias stay resident (index_map -> (0, 0)).
    in_specs = [pl.BlockSpec((tm, in_pad), lambda i: (i, 0))]
    for w in weights:
        in_specs.append(pl.BlockSpec(w.shape, lambda i: (0, 0)))
    in_specs.append(pl.BlockSpec(bias_blob.shape, lambda i: (0, 0)))

    out_specs = pl.BlockSpec((tm, out_pad), lambda i: (i, 0))

    return pl.pallas_call(
        soft_q_mlp_kernel,
        out_shape=jax.ShapeDtypeStruct((padded_batch, out_pad), jnp.float32),
        grid=grid,
        in_specs=in_specs,
        out_specs=out_specs,
        compiler_params=pltpu.CompilerParams(
            dimension_semantics=("parallel",),   # shard batch tiles across TCs (v7x)
            vmem_limit_bytes=32 * 1024 * 1024,   # resident weights + buffered tiles << 32 MiB
        ),
    )(x_padded, *weights, bias_blob)


def soft_q_forward(x, packed, out_dim):
    """x: (batch, inputs) f32; packed: output of pack_params. Returns (batch, out_dim) f32."""
    weights, bias_blob = packed
    batch, in_dim = x.shape
    in_pad = weights[0].shape[0]
    tm = _choose_tm(batch)
    padded_batch = tm * pl.cdiv(batch, tm)
    x_padded = jnp.pad(
        x.astype(jnp.bfloat16),
        ((0, padded_batch - batch), (0, in_pad - in_dim)),
    )
    out = _soft_q_forward_padded(x_padded, weights, bias_blob, tm=tm)
    return out[:batch, :out_dim]


# ----------------------------- reference & init ------------------------------

def init_params(key, inputs, outputs):
    """PyTorch nn.Linear default init: uniform(+/- 1/sqrt(fan_in))."""
    dims = [inputs, 64, 128, 256, 512, outputs]
    params = []
    for i in range(len(dims) - 1):
        fan_in, fan_out = dims[i], dims[i + 1]
        key, kw, kb = jax.random.split(key, 3)
        bound = 1.0 / (fan_in ** 0.5)
        w = jax.random.uniform(kw, (fan_in, fan_out), jnp.float32, -bound, bound)
        b = jax.random.uniform(kb, (fan_out,), jnp.float32, -bound, bound)
        params.append((w, b))
    return params


def reference_forward_f32(x, params):
    h = x.astype(jnp.float32)
    for i, (w, b) in enumerate(params):
        h = h @ w + b[None, :]
        if i < len(params) - 1:
            h = _leaky_relu(h)
    return h


def reference_forward_bf16(x, params):
    """Same bf16-operand / f32-accumulate recipe as the kernel."""
    h = x.astype(jnp.bfloat16)
    for i, (w, b) in enumerate(params):
        z = jnp.dot(
            h, w.astype(jnp.bfloat16), preferred_element_type=jnp.float32
        ) + b[None, :]
        h = (_leaky_relu(z) if i < len(params) - 1 else z)
        if i < len(params) - 1:
            h = h.astype(jnp.bfloat16)
    return h


if __name__ == "__main__":
    key = jax.random.PRNGKey(0)
    k_params, k_x, k_x2 = jax.random.split(key, 3)

    inputs, outputs = 16, 8
    params = init_params(k_params, inputs, outputs)
    packed = pack_params(params)  # device-resident packed params (do once)

    # Small batch (RL action-selection path): single tiny tile, minimal padding.
    batch = 2
    x = jax.random.normal(k_x, (batch, inputs), jnp.float32)
    out = jax.block_until_ready(soft_q_forward(x, packed, outputs))
    assert out.shape == (batch, outputs)
    ref_bf16 = reference_forward_bf16(x, params)   # matches kernel numerics
    ref_f32 = reference_forward_f32(x, params)     # original fp32 semantics
    assert jnp.allclose(out, ref_bf16, atol=1e-2, rtol=1e-2), "mismatch vs bf16 reference (small batch)"
    assert jnp.allclose(out, ref_f32, atol=1e-1, rtol=1e-1), "mismatch vs fp32 reference (small batch)"

    # Larger batch: exercises the multi-step grid + in-kernel half-tile split.
    batch2 = 600
    x2 = jax.random.normal(k_x2, (batch2, inputs), jnp.float32)
    out2 = jax.block_until_ready(soft_q_forward(x2, packed, outputs))
    assert out2.shape == (batch2, outputs)
    ref2_bf16 = reference_forward_bf16(x2, params)
    assert jnp.allclose(out2, ref2_bf16, atol=1e-2, rtol=1e-2), "mismatch vs bf16 reference (large batch)"

    print("KERNEL_OK")
</pallas_src>

<mosaic_0001>
module attributes {stable_mosaic.version = 11 : i64} {
  func.func @soft_q_mlp_kernel(%arg0: i32, %arg1: memref<16x128xbf16, #tpu.memory_space<vmem>>, %arg2: memref<128x128xbf16, #tpu.memory_space<vmem>>, %arg3: memref<128x128xbf16, #tpu.memory_space<vmem>>, %arg4: memref<128x256xbf16, #tpu.memory_space<vmem>>, %arg5: memref<256x512xbf16, #tpu.memory_space<vmem>>, %arg6: memref<512x128xbf16, #tpu.memory_space<vmem>>, %arg7: memref<5x512xf32, #tpu.memory_space<vmem>>, %arg8: memref<16x128xf32, #tpu.memory_space<vmem>>) attributes {dimension_semantics = [#tpu.dimension_semantics<parallel>], iteration_bounds = array<i64: 1>, scalar_prefetch = 0 : i64, scratch_operands = 0 : i64, tpu.core_type = #tpu.core_type<tc>, window_params = [{transform_indices = @transform_0, window_bounds = array<i64: 16, 128>}, {pipeline_mode = #tpu.pipeline_mode<synchronous>, transform_indices = @transform_1, window_bounds = array<i64: 128, 128>}, {pipeline_mode = #tpu.pipeline_mode<synchronous>, transform_indices = @transform_2, window_bounds = array<i64: 128, 128>}, {pipeline_mode = #tpu.pipeline_mode<synchronous>, transform_indices = @transform_3, window_bounds = array<i64: 128, 256>}, {pipeline_mode = #tpu.pipeline_mode<synchronous>, transform_indices = @transform_4, window_bounds = array<i64: 256, 512>}, {pipeline_mode = #tpu.pipeline_mode<synchronous>, transform_indices = @transform_5, window_bounds = array<i64: 512, 128>}, {pipeline_mode = #tpu.pipeline_mode<synchronous>, transform_indices = @transform_6, window_bounds = array<i64: 5, 512>}, {transform_indices = @transform_7, window_bounds = array<i64: 16, 128>}]} {
    %c0 = arith.constant 0 : index
    %c0_0 = arith.constant 0 : index
    %0 = vector.load %arg1[%c0, %c0_0] : memref<16x128xbf16, #tpu.memory_space<vmem>>, vector<16x128xbf16>
    %c0_1 = arith.constant 0 : index
    %c0_2 = arith.constant 0 : index
    %1 = vector.load %arg2[%c0_1, %c0_2] : memref<128x128xbf16, #tpu.memory_space<vmem>>, vector<128x128xbf16>
    %cst = arith.constant dense<0.000000e+00> : vector<16x128xf32>
    %2 = tpu.matmul %0, %1, %cst {dimension_numbers = #tpu.dot_dimension_numbers<[1], [0], [0], [1], [0, 0, 1, 1], [], []>} : vector<16x128xbf16>, vector<128x128xbf16>, vector<16x128xf32> -> vector<16x128xf32>
    %c0_3 = arith.constant 0 : index
    %c0_4 = arith.constant 0 : index
    %3 = vector.load %arg7[%c0_3, %c0_4] : memref<5x512xf32, #tpu.memory_space<vmem>>, vector<1x128xf32>
    %4 = vector.broadcast %3 : vector<1x128xf32> to vector<16x128xf32>
    %5 = arith.addf %2, %4 : vector<16x128xf32>
    %cst_5 = arith.constant 0.000000e+00 : f32
    %6 = vector.broadcast %cst_5 : f32 to vector<16x128xf32>
    %7 = arith.cmpf ogt, %5, %6 : vector<16x128xf32>
    %cst_6 = arith.constant 0.00999999977 : f32
    %8 = vector.broadcast %cst_6 : f32 to vector<16x128xf32>
    %9 = arith.mulf %8, %5 : vector<16x128xf32>
    %10 = arith.select %7, %5, %9 : vector<16x128xi1>, vector<16x128xf32>
    %11 = arith.truncf %10 : vector<16x128xf32> to vector<16x128xbf16>
    %c0_7 = arith.constant 0 : index
    %c0_8 = arith.constant 0 : index
    %12 = vector.load %arg3[%c0_7, %c0_8] : memref<128x128xbf16, #tpu.memory_space<vmem>>, vector<128x128xbf16>
    %cst_9 = arith.constant dense<0.000000e+00> : vector<16x128xf32>
    %13 = tpu.matmul %11, %12, %cst_9 {dimension_numbers = #tpu.dot_dimension_numbers<[1], [0], [0], [1], [0, 0, 1, 1], [], []>} : vector<16x128xbf16>, vector<128x128xbf16>, vector<16x128xf32> -> vector<16x128xf32>
    %c1 = arith.constant 1 : index
    %c0_10 = arith.constant 0 : index
    %14 = vector.load %arg7[%c1, %c0_10] : memref<5x512xf32, #tpu.memory_space<vmem>>, vector<1x128xf32>
    %15 = vector.broadcast %14 : vector<1x128xf32> to vector<16x128xf32>
    %16 = arith.addf %13, %15 : vector<16x128xf32>
    %cst_11 = arith.constant 0.000000e+00 : f32
    %17 = vector.broadcast %cst_11 : f32 to vector<16x128xf32>
    %18 = arith.cmpf ogt, %16, %17 : vector<16x128xf32>
    %cst_12 = arith.constant 0.00999999977 : f32
    %19 = vector.broadcast %cst_12 : f32 to vector<16x128xf32>
    %20 = arith.mulf %19, %16 : vector<16x128xf32>
    %21 = arith.select %18, %16, %20 : vector<16x128xi1>, vector<16x128xf32>
    %22 = arith.truncf %21 : vector<16x128xf32> to vector<16x128xbf16>
    %c0_13 = arith.constant 0 : index
    %c0_14 = arith.constant 0 : index
    %23 = vector.load %arg4[%c0_13, %c0_14] : memref<128x256xbf16, #tpu.memory_space<vmem>>, vector<128x256xbf16>
    %cst_15 = arith.constant dense<0.000000e+00> : vector<16x256xf32>
    %24 = tpu.matmul %22, %23, %cst_15 {dimension_numbers = #tpu.dot_dimension_numbers<[1], [0], [0], [1], [0, 0, 1, 1], [], []>} : vector<16x128xbf16>, vector<128x256xbf16>, vector<16x256xf32> -> vector<16x256xf32>
    %c2 = arith.constant 2 : index
    %c0_16 = arith.constant 0 : index
    %25 = vector.load %arg7[%c2, %c0_16] : memref<5x512xf32, #tpu.memory_space<vmem>>, vector<1x256xf32>
    %26 = vector.broadcast %25 : vector<1x256xf32> to vector<16x256xf32>
    %27 = arith.addf %24, %26 : vector<16x256xf32>
    %cst_17 = arith.constant 0.000000e+00 : f32
    %28 = vector.broadcast %cst_17 : f32 to vector<16x256xf32>
    %29 = arith.cmpf ogt, %27, %28 : vector<16x256xf32>
    %cst_18 = arith.constant 0.00999999977 : f32
    %30 = vector.broadcast %cst_18 : f32 to vector<16x256xf32>
    %31 = arith.mulf %30, %27 : vector<16x256xf32>
    %32 = arith.select %29, %27, %31 : vector<16x256xi1>, vector<16x256xf32>
    %33 = arith.truncf %32 : vector<16x256xf32> to vector<16x256xbf16>
    %c0_19 = arith.constant 0 : index
    %c0_20 = arith.constant 0 : index
    %34 = vector.load %arg5[%c0_19, %c0_20] : memref<256x512xbf16, #tpu.memory_space<vmem>>, vector<256x512xbf16>
    %cst_21 = arith.constant dense<0.000000e+00> : vector<16x512xf32>
    %35 = tpu.matmul %33, %34, %cst_21 {dimension_numbers = #tpu.dot_dimension_numbers<[1], [0], [0], [1], [0, 0, 1, 1], [], []>} : vector<16x256xbf16>, vector<256x512xbf16>, vector<16x512xf32> -> vector<16x512xf32>
    %c3 = arith.constant 3 : index
    %c0_22 = arith.constant 0 : index
    %36 = vector.load %arg7[%c3, %c0_22] : memref<5x512xf32, #tpu.memory_space<vmem>>, vector<1x512xf32>
    %37 = vector.broadcast %36 : vector<1x512xf32> to vector<16x512xf32>
    %38 = arith.addf %35, %37 : vector<16x512xf32>
    %cst_23 = arith.constant 0.000000e+00 : f32
    %39 = vector.broadcast %cst_23 : f32 to vector<16x512xf32>
    %40 = arith.cmpf ogt, %38, %39 : vector<16x512xf32>
    %cst_24 = arith.constant 0.00999999977 : f32
    %41 = vector.broadcast %cst_24 : f32 to vector<16x512xf32>
    %42 = arith.mulf %41, %38 : vector<16x512xf32>
    %43 = arith.select %40, %38, %42 : vector<16x512xi1>, vector<16x512xf32>
    %44 = arith.truncf %43 : vector<16x512xf32> to vector<16x512xbf16>
    %c0_25 = arith.constant 0 : index
    %c0_26 = arith.constant 0 : index
    %45 = vector.load %arg6[%c0_25, %c0_26] : memref<512x128xbf16, #tpu.memory_space<vmem>>, vector<512x128xbf16>
    %cst_27 = arith.constant dense<0.000000e+00> : vector<16x128xf32>
    %46 = tpu.matmul %44, %45, %cst_27 {dimension_numbers = #tpu.dot_dimension_numbers<[1], [0], [0], [1], [0, 0, 1, 1], [], []>} : vector<16x512xbf16>, vector<512x128xbf16>, vector<16x128xf32> -> vector<16x128xf32>
    %c4 = arith.constant 4 : index
    %c0_28 = arith.constant 0 : index
    %47 = vector.load %arg7[%c4, %c0_28] : memref<5x512xf32, #tpu.memory_space<vmem>>, vector<1x128xf32>
    %48 = vector.broadcast %47 : vector<1x128xf32> to vector<16x128xf32>
    %49 = arith.addf %46, %48 : vector<16x128xf32>
    %c0_29 = arith.constant 0 : index
    %c0_30 = arith.constant 0 : index
    %50 = vector.load %arg8[%c0_29, %c0_30] : memref<16x128xf32, #tpu.memory_space<vmem>>, vector<16x128xf32>
    tpu.vector_store %arg8[%c0_29, %c0_30], %49 {strides = array<i32>} : memref<16x128xf32, #tpu.memory_space<vmem>>, vector<16x128xf32>,
    return
  }
  func.func @transform_0(%arg0: i32) -> (i32, i32) {
    %c0_i32 = arith.constant 0 : i32
    %c0_i32_0 = arith.constant 0 : i32
    return %arg0, %c0_i32 : i32, i32
  }
  func.func @transform_1(%arg0: i32) -> (i32, i32) {
    %c0_i32 = arith.constant 0 : i32
    %c0_i32_0 = arith.constant 0 : i32
    %c0_i32_1 = arith.constant 0 : i32
    return %c0_i32, %c0_i32_0 : i32, i32
  }
  func.func @transform_2(%arg0: i32) -> (i32, i32) {
    %c0_i32 = arith.constant 0 : i32
    %c0_i32_0 = arith.constant 0 : i32
    %c0_i32_1 = arith.constant 0 : i32
    return %c0_i32, %c0_i32_0 : i32, i32
  }
  func.func @transform_3(%arg0: i32) -> (i32, i32) {
    %c0_i32 = arith.constant 0 : i32
    %c0_i32_0 = arith.constant 0 : i32
    %c0_i32_1 = arith.constant 0 : i32
    return %c0_i32, %c0_i32_0 : i32, i32
  }
  func.func @transform_4(%arg0: i32) -> (i32, i32) {
    %c0_i32 = arith.constant 0 : i32
    %c0_i32_0 = arith.constant 0 : i32
    %c0_i32_1 = arith.constant 0 : i32
    return %c0_i32, %c0_i32_0 : i32, i32
  }
  func.func @transform_5(%arg0: i32) -> (i32, i32) {
    %c0_i32 = arith.constant 0 : i32
    %c0_i32_0 = arith.constant 0 : i32
    %c0_i32_1 = arith.constant 0 : i32
    return %c0_i32, %c0_i32_0 : i32, i32
  }
  func.func @transform_6(%arg0: i32) -> (i32, i32) {
    %c0_i32 = arith.constant 0 : i32
    %c0_i32_0 = arith.constant 0 : i32
    %c0_i32_1 = arith.constant 0 : i32
    return %c0_i32, %c0_i32_0 : i32, i32
  }
  func.func @transform_7(%arg0: i32) -> (i32, i32) {
    %c0_i32 = arith.constant 0 : i32
    %c0_i32_0 = arith.constant 0 : i32
    return %arg0, %c0_i32 : i32, i32
  }
}

</mosaic_0001>

<bundles_post_ra>
// kernel: _soft_q_forward_padded.1
= control target key start
LH: loop header
LB: loop body
LE: loop exit
PB: predicated region body
PF: predicated region fallthrough
CT: control target
= control target key end

     0   :  { %12 = vsyncpa [#allocation3], 0  ;;  %s2214_s0 = inlined_call_operand.hbm [shape: bf16[16,128], index: 0, kind: input, shape index: {}]   ;;  %s2215_s1 = inlined_call_operand.hbm [shape: bf16[128,128], index: 1, kind: input, shape index: {}]   ;;  %s2216_s2 = inlined_call_operand.hbm [shape: bf16[128,128], index: 2, kind: input, shape index: {}]   ;;  %s2217_s3 = inlined_call_operand.hbm [shape: bf16[128,256], index: 3, kind: input, shape index: {}]   ;;  %s2218_s4 = inlined_call_operand.hbm [shape: bf16[256,512], index: 4, kind: input, shape index: {}]   ;;  %s2219_s5 = inlined_call_operand.hbm [shape: bf16[512,128], index: 5, kind: input, shape index: {}]   ;;  %s2220_s6 = inlined_call_operand.hbm [shape: f32[5,512], index: 6, kind: input, shape index: {}]   ;;  %s2221_s7 = inlined_call_operand.hbm [shape: f32[16,128], index: 7, kind: output, shape index: {}]  }
   0x1   :  { %13 = vsyncpa [#allocation6], 0 }
   0x2   :  { %14 = vsyncpa [#allocation9], 0 }
   0x3   :  { %15 = vsyncpa [#allocation12], 0 }
   0x4   :  { %16 = vsyncpa [#allocation4], 0  ;;  %s2006_s24 = smov [#allocation5]   ;;  %s2007_s26 = smov [#allocation8]  }
   0x5   :  { %s34_s25 = sshll.u32 %s2006_s24, 4  ;;  %s58_s27 = sshll.u32 %s2007_s26, 4  ;;  %s35_s25 = int_to_ptr.vmem [resolvable:$true] %s34_s25  ;;  %s2063_s27 = int_to_ptr.vmem [resolvable:$true] %s58_s27 }
   0x6   :  { %s1820_s30 = scalar_lea.hbm %s2215_s1, 1024 }
   0x7   :  { %p1821_p0 = scmp.ne.s32.totalorder %s2215_s1, %s1820_s30  ;;  %p1824_p1 = scmp.lt.u32.totalorder %s1820_s30, %s2215_s1 }
   0x9   :  { %p1826_p2 = pnand %p1824_p1, %p1821_p0 }
   0xb   :  { %1829 = shalt.err (!%p1826_p2)
}
   0xc   :  { %s1830_s12 = scalar_lea.vmem %s35_s25, 1024  ;;  %p1835_p4 = scmp.lt.s32.totalorder %s35_s25, %s35_s25 }
   0xd   :  { %p1831_p3 = scmp.ne.s32.totalorder %s35_s25, %s1830_s12  ;;  %p1836_p5 = scmp.lt.s32.totalorder %s1830_s12, %s1830_s12 }
   0xf   :  { %p1837_p6 = por %p1836_p5, %p1835_p4 }
  0x11   :  { %p1838_p7 = pnand %p1837_p6, %p1831_p3 }
  0x13   :  { %1841 = shalt.err (!%p1838_p7)
}
  0x14   :  { %s2008_s13 = smov 64   ;;  %s2009_s14 = smov 4  }
  0x15   :  { %40 = dma.hbm_to_vmem [thread:$0]  %s2215_s1, 1024, %s35_s25, [#allocation6], %s2008_s13, %s2008_s13, %s2009_s14  }
  0x16   :  { %s1842_s19 = scalar_lea.hbm %s2217_s3, 2048 }
  0x17   :  { %p1843_p8 = scmp.ne.s32.totalorder %s2217_s3, %s1842_s19  ;;  %p1846_p9 = scmp.lt.u32.totalorder %s1842_s19, %s2217_s3 }
  0x19   :  { %p1848_p10 = pnand %p1846_p9, %p1843_p8 }
  0x1b   :  { %1851 = shalt.err (!%p1848_p10)
}
  0x1c   :  { %s1852_s24 = scalar_lea.vmem %s2063_s27, 2048  ;;  %p1857_p12 = scmp.lt.s32.totalorder %s2063_s27, %s2063_s27 }
  0x1d   :  { %p1853_p11 = scmp.ne.s32.totalorder %s2063_s27, %s1852_s24  ;;  %p1858_p13 = scmp.lt.s32.totalorder %s1852_s24, %s1852_s24 }
  0x1f   :  { %p1859_p0 = por %p1858_p13, %p1857_p12 }
  0x21   :  { %p1860_p1 = pnand %p1859_p0, %p1853_p11 }
  0x23   :  { %1863 = shalt.err (!%p1860_p1)
}
  0x24   :  { %s2010_s1 = smov 128   ;;  %s2011_s25 = smov 8  }
  0x25   :  { %64 = dma.hbm_to_vmem [thread:$0]  %s2217_s3, 2048, %s2063_s27, [#allocation9], %s2010_s1, %s2010_s1, %s2011_s25  }
  0x26   :  { %s2012_s29 = smov [#allocation11]   ;;  %s2013_s8 = smov [#allocation2]  }
  0x27   :  { %s82_s30 = sshll.u32 %s2012_s29, 4  ;;  %s22_s9 = sshll.u32 %s2013_s8, 4  ;;  %s83_s30 = int_to_ptr.vmem [resolvable:$true] %s82_s30  ;;  %s2100_s9 = int_to_ptr.vmem [resolvable:$true] %s22_s9 }
  0x28   :  { %s1864_s12 = scalar_lea.hbm %s2219_s5, 4096 }
  0x29   :  { %p1865_p2 = scmp.ne.s32.totalorder %s2219_s5, %s1864_s12  ;;  %p1868_p3 = scmp.lt.u32.totalorder %s1864_s12, %s2219_s5 }
  0x2b   :  { %p1870_p4 = pnand %p1868_p3, %p1865_p2 }
  0x2d   :  { %1873 = shalt.err (!%p1870_p4)
}
  0x2e   :  { %s1874_s3 = scalar_lea.vmem %s83_s30, 4096  ;;  %p1879_p6 = scmp.lt.s32.totalorder %s83_s30, %s83_s30 }
  0x2f   :  { %p1875_p5 = scmp.ne.s32.totalorder %s83_s30, %s1874_s3  ;;  %p1880_p7 = scmp.lt.s32.totalorder %s1874_s3, %s1874_s3 }
  0x31   :  { %p1881_p8 = por %p1880_p7, %p1879_p6 }
  0x33   :  { %p1882_p9 = pnand %p1881_p8, %p1875_p5 }
  0x35   :  { %1885 = shalt.err (!%p1882_p9)
}
  0x36   :  { %88 = dma.hbm_to_vmem [thread:$0]  %s2219_s5, 4096, %s83_s30, [#allocation12], %s2008_s13, %s2008_s13, %s2009_s14  }
  0x37   :  { %s1886_s22 = scalar_lea.hbm %s2214_s0, 128 }
  0x38   :  { %p1887_p10 = scmp.ne.s32.totalorder %s2214_s0, %s1886_s22  ;;  %p1890_p11 = scmp.lt.u32.totalorder %s1886_s22, %s2214_s0 }
  0x3a   :  { %p1892_p12 = pnand %p1890_p11, %p1887_p10 }
  0x3c   :  { %1895 = shalt.err (!%p1892_p12)
}
  0x3d   :  { %s1896_s29 = scalar_lea.vmem %s2100_s9, 128  ;;  %p1901_p0 = scmp.lt.s32.totalorder %s2100_s9, %s2100_s9 }
  0x3e   :  { %p1897_p13 = scmp.ne.s32.totalorder %s2100_s9, %s1896_s29  ;;  %p1902_p1 = scmp.lt.s32.totalorder %s1896_s29, %s1896_s29 }
  0x40   :  { %p1903_p2 = por %p1902_p1, %p1901_p0 }
  0x42   :  { %p1904_p3 = pnand %p1903_p2, %p1897_p13 }
  0x44   :  { %1907 = shalt.err (!%p1904_p3)
}
  0x45   :  { %28 = dma.hbm_to_vmem [thread:$0]  %s2214_s0, 128, %s2100_s9, [#allocation3], %s2008_s13, %s2008_s13, %s2009_s14  }
  0x46   :  { %s2014_s8 = smov [#allocation7]   ;;  %s2015_s11 = smov [#allocation10]  }
  0x47   :  { %s46_s10 = sshll.u32 %s2014_s8, 4  ;;  %s70_s12 = sshll.u32 %s2015_s11, 4  ;;  %s47_s10 = int_to_ptr.vmem [resolvable:$true] %s46_s10  ;;  %s2137_s12 = int_to_ptr.vmem [resolvable:$true] %s70_s12 }
  0x48   :  { %s1908_s17 = scalar_lea.hbm %s2216_s2, 1024 }
  0x49   :  { %p1909_p4 = scmp.ne.s32.totalorder %s2216_s2, %s1908_s17  ;;  %p1912_p5 = scmp.lt.u32.totalorder %s1908_s17, %s2216_s2 }
  0x4b   :  { %p1914_p6 = pnand %p1912_p5, %p1909_p4 }
  0x4d   :  { %1917 = shalt.err (!%p1914_p6)
}
  0x4e   :  { %s1918_s0 = scalar_lea.vmem %s47_s10, 1024  ;;  %p1923_p8 = scmp.lt.s32.totalorder %s47_s10, %s47_s10 }
  0x4f   :  { %p1919_p7 = scmp.ne.s32.totalorder %s47_s10, %s1918_s0  ;;  %p1924_p9 = scmp.lt.s32.totalorder %s1918_s0, %s1918_s0 }
  0x51   :  { %p1925_p10 = por %p1924_p9, %p1923_p8 }
  0x53   :  { %p1926_p11 = pnand %p1925_p10, %p1919_p7 }
  0x55   :  { %1929 = shalt.err (!%p1926_p11)
}
  0x56   :  { %52 = dma.hbm_to_vmem [thread:$0]  %s2216_s2, 1024, %s47_s10, [#allocation6], %s2008_s13, %s2008_s13, %s2009_s14  }
  0x57   :  { %s1930_s23 = scalar_lea.hbm %s2218_s4, 8192 }
  0x58   :  { %p1931_p12 = scmp.ne.s32.totalorder %s2218_s4, %s1930_s23  ;;  %p1934_p13 = scmp.lt.u32.totalorder %s1930_s23, %s2218_s4 }
  0x5a   :  { %p1936_p0 = pnand %p1934_p13, %p1931_p12 }
  0x5c   :  { %1939 = shalt.err (!%p1936_p0)
}
  0x5d   :  { %s1940_s5 = scalar_lea.vmem %s2137_s12, 8192  ;;  %p1945_p2 = scmp.lt.s32.totalorder %s2137_s12, %s2137_s12 }
  0x5e   :  { %p1941_p1 = scmp.ne.s32.totalorder %s2137_s12, %s1940_s5  ;;  %p1946_p3 = scmp.lt.s32.totalorder %s1940_s5, %s1940_s5 }
  0x60   :  { %p1947_p4 = por %p1946_p3, %p1945_p2 }
  0x62   :  { %p1948_p5 = pnand %p1947_p4, %p1941_p1 }
  0x64   :  { %1951 = shalt.err (!%p1948_p5)
}
  0x65   :  { %s2016_s2 = smov 256   ;;  %s2017_s13 = smov 16  }
  0x66   :  { %76 = dma.hbm_to_vmem [thread:$0]  %s2218_s4, 8192, %s2137_s12, [#allocation9], %s2016_s2, %s2016_s2, %s2017_s13  }
  0x67   :  { %s2018_s8 = smov [#allocation13]   ;;  %s1952_s16 = scalar_lea.hbm %s2220_s6, 512 }
  0x68   :  { %s95_s10 = sshll.u32 %s2018_s8, 4  ;;  %p1953_p6 = scmp.ne.s32.totalorder %s2220_s6, %s1952_s16  ;;  %s96_s10 = int_to_ptr.vmem [resolvable:$true] %s95_s10 }
  0x69   :  { %p1956_p7 = scmp.lt.u32.totalorder %s1952_s16, %s2220_s6 }
  0x6b   :  { %p1958_p8 = pnand %p1956_p7, %p1953_p6 }
  0x6d   :  { %1961 = shalt.err (!%p1958_p8)
}
  0x6e   :  { %s1962_s19 = scalar_lea.vmem %s96_s10, 512  ;;  %p1967_p10 = scmp.lt.s32.totalorder %s96_s10, %s96_s10 }
  0x6f   :  { %p1963_p9 = scmp.ne.s32.totalorder %s96_s10, %s1962_s19  ;;  %p1968_p11 = scmp.lt.s32.totalorder %s1962_s19, %s1962_s19 }
  0x71   :  { %p1969_p12 = por %p1968_p11, %p1967_p10 }
  0x73   :  { %p1970_p13 = pnand %p1969_p12, %p1963_p9 }
  0x75   :  { %1973 = shalt.err (!%p1970_p13)
}
  0x76   :  { %98 = dma.hbm_to_vmem [thread:$0]  %s2220_s6, 512, %s96_s10, [#allocation12]  }
  0x77   :  { %1996 = dma.done.wait [#allocation3], 128  }
  0x78   :  { %1997 = vsyncadd [#allocation3], 4294967168 }
  0x79   :  { %1998 = dma.done.wait [#allocation6], 2048  }
  0x7a   :  { %1999 = vsyncadd [#allocation6], 4294965248 }
  0x7b   :  { %2000 = dma.done.wait [#allocation9], 10240  }
  0x7c   :  { %2001 = vsyncadd [#allocation9], 4294957056 }
  0x7d   :  { %2002 = dma.done.wait [#allocation12], 4608  }
  0x7e   :  { %2003 = vsyncadd [#allocation12], 4294962688  ;;  %v2019_v0 = vmov 0.0   ;;  %vm2020_vm0 = vmmov 0   ;;  %v1651_v1 = vld [vmem:[#allocation5] sm:$0xff]   ;;  %v1652_v2 = vld [vmem:[#allocation5 + $0x8] sm:$0xff]  }
  0x7f   :  { %1594 = vmatprep.subr.bf16.mxu0 %v2019_v0  ;;  %1610 = vmatprep.mubr.msk.bf16.mxu0 %vm2020_vm0, %v2019_v0  ;;  %v1653_v3 = vld [vmem:[#allocation5 + $0x10] sm:$0xff]   ;;  %v1660_v4 = vld [vmem:[#allocation7] sm:$0xff]   ;;  %v1654_v5 = vld [vmem:[#allocation5 + $0x18] sm:$0xff]   ;;  %v2021_v46 = vmov 0   ;;  %s2022_s6 = smov [#allocation14]  }
  0x80   :  { %1614 = vmatprep.subr.bf16.mxu1 %v2019_v0  ;;  %1630 = vmatprep.mubr.msk.bf16.mxu1 %vm2020_vm0, %v2019_v0  ;;  %v1661_v6 = vld [vmem:[#allocation7 + $0x8] sm:$0xff]   ;;  %v1655_v7 = vld [vmem:[#allocation5 + $0x20] sm:$0xff]   ;;  %v1662_v8 = vld [vmem:[#allocation7 + $0x10] sm:$0xff]   ;;  %s1388_s0 = sshll.u32 %s2022_s6, 4  ;;  %s1389_s0 = int_to_ptr.vmem [resolvable:$true] %s1388_s0 }
  0x81   :  { %1595 = vmatpush3.bf16.msra.mxu0 %v1651_v1  ;;  %1615 = vmatpush3.bf16.msra.mxu1 %v1660_v4  ;;  %v1656_v9 = vld [vmem:[#allocation5 + $0x28] sm:$0xff]   ;;  %v1663_v10 = vld [vmem:[#allocation7 + $0x18] sm:$0xff]   ;;  %v1657_v11 = vld [vmem:[#allocation5 + $0x30] sm:$0xff]   ;;  %s1974_s9 = scalar_lea.vmem %s1389_s0, 256  ;;  %p1979_p1 = scmp.lt.s32.totalorder %s1389_s0, %s1389_s0 }
  0x82   :  { %1596 = vmatprep.subr.bf16.mxu0 %v2019_v0  ;;  %1616 = vmatprep.subr.bf16.mxu1 %v2019_v0  ;;  %v1664_v12 = vld [vmem:[#allocation7 + $0x20] sm:$0xff]   ;;  %v1658_v13 = vld [vmem:[#allocation5 + $0x38] sm:$0xff]   ;;  %v1665_v14 = vld [vmem:[#allocation7 + $0x28] sm:$0xff]   ;;  %p1975_p0 = scmp.ne.s32.totalorder %s1389_s0, %s1974_s9  ;;  %p1980_p2 = scmp.lt.s32.totalorder %s1974_s9, %s1974_s9 }
  0x83   :  { %v1659_v15 = vld [vmem:[#allocation2] sm:$0xff]   ;;  %v1666_v16 = vld [vmem:[#allocation7 + $0x30] sm:$0xff]   ;;  %v1668_v18 = vld [vmem:[#allocation8] ss:$8 sps:$4 sm:$0xff]  }
  0x84   :  { %v1667_v17 = vld [vmem:[#allocation7 + $0x38] sm:$0xff]   ;;  %v1670_v19 = vld [vmem:[#allocation8 + $0x4] ss:$8 sps:$4 sm:$0xff]   ;;  %v1674_v23 = vld [vmem:[#allocation8 + $0x20] ss:$8 sps:$4 sm:$0xff]   ;;  %p1981_p3 = por %p1980_p2, %p1979_p1 }
  0x85   :  { %1597 = vmatpush3.bf16.msra.mxu0 %v1652_v2  ;;  %1617 = vmatpush3.bf16.msra.mxu1 %v1661_v6  ;;  %v1673_v20 = vld [vmem:[#allocation8 + $0x14] ss:$8 sps:$4 sm:$0xff]   ;;  %v1671_v21 = vld [vmem:[#allocation8 + $0x10] ss:$8 sps:$4 sm:$0xff]   ;;  %v1676_v22 = vld [vmem:[#allocation8 + $0x24] ss:$8 sps:$4 sm:$0xff]  }
  0x86   :  { %1598 = vmatprep.subr.bf16.mxu0 %v2019_v0  ;;  %1618 = vmatprep.subr.bf16.mxu1 %v2019_v0  ;;  %v1679_v24 = vld [vmem:[#allocation8 + $0x34] ss:$8 sps:$4 sm:$0xff]   ;;  %v1677_v25 = vld [vmem:[#allocation8 + $0x30] ss:$8 sps:$4 sm:$0xff]   ;;  %v1682_v26 = vld [vmem:[#allocation8 + $0x44] ss:$8 sps:$4 sm:$0xff]   ;;  %p1982_p4 = pnand %p1981_p3, %p1975_p0 }
  0x87   :  { %v1680_v27 = vld [vmem:[#allocation8 + $0x40] ss:$8 sps:$4 sm:$0xff]   ;;  %v1685_v28 = vld [vmem:[#allocation8 + $0x54] ss:$8 sps:$4 sm:$0xff]   ;;  %v1683_v29 = vld [vmem:[#allocation8 + $0x50] ss:$8 sps:$4 sm:$0xff]  }
  0x88   :  { %v139_v30 = vld [vmem:[#allocation13] ss:$0 sm:$0xff]  ;;  %v1688_v42 = vld [vmem:[#allocation8 + $0x64] ss:$8 sps:$4 sm:$0xff]   ;;  %v1691_v44 = vld [vmem:[#allocation8 + $0x74] ss:$8 sps:$4 sm:$0xff]  }
  0x89   :  { %1599 = vmatpush3.bf16.msra.mxu0 %v1653_v3  ;;  %1619 = vmatpush3.bf16.msra.mxu1 %v1662_v8  ;;  %v1686_v43 = vld [vmem:[#allocation8 + $0x60] ss:$8 sps:$4 sm:$0xff]   ;;  %v1689_v45 = vld [vmem:[#allocation8 + $0x70] ss:$8 sps:$4 sm:$0xff]   ;;  %v1694_v48 = vld [vmem:[#allocation10 + $0x4] ss:$16 sps:$4 sm:$0xff]  }
  0x8a   :  { %1600 = vmatprep.subr.bf16.mxu0 %v2019_v0  ;;  %1620 = vmatprep.subr.bf16.mxu1 %v2019_v0  ;;  %v1692_v47 = vld [vmem:[#allocation10] ss:$16 sps:$4 sm:$0xff]   ;;  %v1697_v49 = vld [vmem:[#allocation10 + $0xc] ss:$16 sps:$4 sm:$0xff]   ;;  %v1700_v50 = vld [vmem:[#allocation10 + $0x24] ss:$16 sps:$4 sm:$0xff]  }
  0x8b   :  { %v1698_v51 = vld [vmem:[#allocation10 + $0x20] ss:$16 sps:$4 sm:$0xff]   ;;  %v1706_v52 = vld [vmem:[#allocation10 + $0x44] ss:$16 sps:$4 sm:$0xff]  }
  0x8c   :  { %v1704_v53 = vld [vmem:[#allocation10 + $0x40] ss:$16 sps:$4 sm:$0xff]   ;;  %v1712_v54 = vld [vmem:[#allocation10 + $0x64] ss:$16 sps:$4 sm:$0xff]  }
  0x8d   :  { %1601 = vmatpush3.bf16.msra.mxu0 %v1654_v5  ;;  %1621 = vmatpush3.bf16.msra.mxu1 %v1663_v10  ;;  %v1710_v55 = vld [vmem:[#allocation10 + $0x60] ss:$16 sps:$4 sm:$0xff]   ;;  %v1718_v56 = vld [vmem:[#allocation10 + $0x84] ss:$16 sps:$4 sm:$0xff]  }
  0x8e   :  { %1602 = vmatprep.subr.bf16.mxu0 %v2019_v0  ;;  %1622 = vmatprep.subr.bf16.mxu1 %v2019_v0  ;;  %v1716_v57 = vld [vmem:[#allocation10 + $0x80] ss:$16 sps:$4 sm:$0xff]   ;;  %v1724_v58 = vld [vmem:[#allocation10 + $0xa4] ss:$16 sps:$4 sm:$0xff]  }
  0x8f   :  { %v1722_v59 = vld [vmem:[#allocation10 + $0xa0] ss:$16 sps:$4 sm:$0xff]   ;;  %v1730_v60 = vld [vmem:[#allocation10 + $0xc4] ss:$16 sps:$4 sm:$0xff]  }
  0x90   :  { %v1728_v61 = vld [vmem:[#allocation10 + $0xc0] ss:$16 sps:$4 sm:$0xff]   ;;  %v1736_v62 = vld [vmem:[#allocation10 + $0xe4] ss:$16 sps:$4 sm:$0xff]  }
  0x91   :  { %1603 = vmatpush3.bf16.msra.mxu0 %v1655_v7  ;;  %1623 = vmatpush3.bf16.msra.mxu1 %v1664_v12  ;;  %v1734_v63 = vld [vmem:[#allocation10 + $0xe0] ss:$16 sps:$4 sm:$0xff]   ;;  %v1748_v2 = vld [vmem:[#allocation10 + $0x124] ss:$16 sps:$4 sm:$0xff]  }
  0x92   :  { %1604 = vmatprep.subr.bf16.mxu0 %v2019_v0  ;;  %1624 = vmatprep.subr.bf16.mxu1 %v2019_v0  ;;  %v1740_v1 = vld [vmem:[#allocation10 + $0x100] ss:$16 sps:$4 sm:$0xff]   ;;  %v1754_v4 = vld [vmem:[#allocation10 + $0x144] ss:$16 sps:$4 sm:$0xff]  }
  0x93   :  { %v1746_v3 = vld [vmem:[#allocation10 + $0x120] ss:$16 sps:$4 sm:$0xff]   ;;  %v1760_v6 = vld [vmem:[#allocation10 + $0x164] ss:$16 sps:$4 sm:$0xff]  }
  0x94   :  { %v1752_v5 = vld [vmem:[#allocation10 + $0x140] ss:$16 sps:$4 sm:$0xff]   ;;  %v1766_v8 = vld [vmem:[#allocation10 + $0x184] ss:$16 sps:$4 sm:$0xff]  }
  0x95   :  { %1605 = vmatpush3.bf16.msra.mxu0 %v1656_v9  ;;  %1625 = vmatpush3.bf16.msra.mxu1 %v1665_v14  ;;  %v1758_v7 = vld [vmem:[#allocation10 + $0x160] ss:$16 sps:$4 sm:$0xff]  }
  0x96   :  { %1606 = vmatprep.subr.bf16.mxu0 %v2019_v0  ;;  %1626 = vmatprep.subr.bf16.mxu1 %v2019_v0  ;;  %v1764_v9 = vld [vmem:[#allocation10 + $0x180] ss:$16 sps:$4 sm:$0xff]  }
  0x97   :  { %v258_v10 = vld [vmem:[#allocation13 + $0x1] ss:$0 sm:$0xff] }
  0x99   :  { %1607 = vmatpush3.bf16.msra.mxu0 %v1657_v11  ;;  %1627 = vmatpush3.bf16.msra.mxu1 %v1666_v16 }
  0x9a   :  { %1608 = vmatprep.subr.bf16.mxu0 %v2019_v0  ;;  %1628 = vmatprep.subr.bf16.mxu1 %v2019_v0  ;;  %v1742_v0 = vld [vmem:[#allocation10 + $0x104] ss:$16 sps:$4 sm:$0xff]  }
  0x9d   :  { %1609 = vmatpush3.bf16.msra.mxu0 %v1658_v13  ;;  %1629 = vmatpush3.bf16.msra.mxu1 %v1667_v17 }
  0x9e   :  { %464 = vmatprep.subr.bf16.mxu0 %v1670_v19  ;;  %928 = vmatprep.subr.bf16.mxu1 %v1694_v48  ;;  %v1775_v48 = vld [vmem:[#allocation10 + $0x1ac] ss:$16 sps:$4 sm:$0xff]  }
  0xa0   :  { %1611 = vmatmul.mubr.bf16.vlgmr.msra.gmra.mrb[0].mxu0 %v1659_v15 }
  0xa1   :  { %465 = vmatpush1.bf16.msra.mxu0 %v1668_v18  ;;  %496 = vmatprep.mubr.bf16.mxu0 %v2021_v46  ;;  %v1767_v46 = vld [vmem:[#allocation10 + $0x188] ss:$16 sps:$4 sm:$0xff]  }
  0xa2   :  { %466 = vmatprep.subr.bf16.mxu0 %v1673_v20 }
  0xa5   :  { %467 = vmatpush1.bf16.msra.mxu0 %v1671_v21  ;;  %v1695_v21 = vld [vmem:[#allocation10 + $0x8] ss:$16 sps:$4 sm:$0xff]  }
  0xa6   :  { %468 = vmatprep.subr.bf16.mxu0 %v1676_v22 }
  0xa9   :  { %469 = vmatpush1.bf16.msra.mxu0 %v1674_v23  ;;  %v1703_v23 = vld [vmem:[#allocation10 + $0x2c] ss:$16 sps:$4 sm:$0xff]  }
  0xaa   :  { %470 = vmatprep.subr.bf16.mxu0 %v1679_v24  ;;  %v1701_v24 = vld [vmem:[#allocation10 + $0x28] ss:$16 sps:$4 sm:$0xff]  }
  0xad   :  { %471 = vmatpush1.bf16.msra.mxu0 %v1677_v25  ;;  %v1709_v25 = vld [vmem:[#allocation10 + $0x4c] ss:$16 sps:$4 sm:$0xff]  }
  0xae   :  { %472 = vmatprep.subr.bf16.mxu0 %v1682_v26  ;;  %v1707_v26 = vld [vmem:[#allocation10 + $0x48] ss:$16 sps:$4 sm:$0xff]  }
  0xb1   :  { %473 = vmatpush1.bf16.msra.mxu0 %v1680_v27  ;;  %v1715_v27 = vld [vmem:[#allocation10 + $0x6c] ss:$16 sps:$4 sm:$0xff]  }
  0xb2   :  { %474 = vmatprep.subr.bf16.mxu0 %v1685_v28  ;;  %v1713_v28 = vld [vmem:[#allocation10 + $0x68] ss:$16 sps:$4 sm:$0xff]  }
  0xb5   :  { %475 = vmatpush1.bf16.msra.mxu0 %v1683_v29  ;;  %v1721_v29 = vld [vmem:[#allocation10 + $0x8c] ss:$16 sps:$4 sm:$0xff]  }
  0xb6   :  { %476 = vmatprep.subr.bf16.mxu0 %v1688_v42  ;;  %v1755_v42 = vld [vmem:[#allocation10 + $0x148] ss:$16 sps:$4 sm:$0xff]  }
  0xb9   :  { %477 = vmatpush1.bf16.msra.mxu0 %v1686_v43  ;;  %v1763_v43 = vld [vmem:[#allocation10 + $0x16c] ss:$16 sps:$4 sm:$0xff]  }
  0xba   :  { %478 = vmatprep.subr.bf16.mxu0 %v1691_v44  ;;  %v1761_v44 = vld [vmem:[#allocation10 + $0x168] ss:$16 sps:$4 sm:$0xff]  }
  0xbd   :  { %479 = vmatpush1.bf16.msra.mxu0 %v1689_v45  ;;  %v1769_v45 = vld [vmem:[#allocation10 + $0x18c] ss:$16 sps:$4 sm:$0xff]  }
  0xbe   :  { %971 = vmatprep.subr.bf16.mxu0 %v1697_v49  ;;  %v1770_v49 = vld [vmem:[#allocation10 + $0x1a0] ss:$16 sps:$4 sm:$0xff]  }
 0x173   :  { %v228_v31 = vpop.f32.mrb[0].mxu0 }
 0x174   :  { %v229_v32 = vadd.f32 %v228_v31, %v139_v30  ;;  %v1612_v33 = vpop.f32.mrb[1].mxu0  ;;  %v1727_v31 = vld [vmem:[#allocation10 + $0xac] ss:$16 sps:$4 sm:$0xff]  }
 0x175   :  { %v231_v34 = vpop.f32.mrb[2].mxu0  ;;  %v1733_v33 = vld [vmem:[#allocation10 + $0xcc] ss:$16 sps:$4 sm:$0xff]  }
 0x176   :  { %v237_v35 = vmul.f32 0.01, %v229_v32  ;;  %v232_v36 = vadd.f32 %v231_v34, %v139_v30  ;;  %v1613_v37 = vpop.f32.mrb[3].mxu0  ;;  %vm235_vm1 = vcmp.gt.f32.partialorder %v229_v32, 0.0  ;;  %v1719_v30 = vld [vmem:[#allocation10 + $0x88] ss:$16 sps:$4 sm:$0xff]  }
 0x177   :  { %v1731_v34 = vld [vmem:[#allocation10 + $0xc8] ss:$16 sps:$4 sm:$0xff]   ;;  %v1745_v37 = vld [vmem:[#allocation10 + $0x10c] ss:$16 sps:$4 sm:$0xff]  }
 0x178   :  { %vm236_vm2 = vcmp.gt.f32.partialorder %v232_v36, 0.0  ;;  %v238_v38 = vmul.f32 0.01, %v232_v36  ;;  %v239_v39 = vsel %vm235_vm1, %v229_v32, %v237_v35  ;;  %v1725_v32 = vld [vmem:[#allocation10 + $0xa8] ss:$16 sps:$4 sm:$0xff]  }
 0x179   :  { %v1739_v35 = vld [vmem:[#allocation10 + $0xec] ss:$16 sps:$4 sm:$0xff]  }
 0x17a   :  { %v240_v40 = vsel %vm236_vm2, %v232_v36, %v238_v38  ;;  %v1737_v36 = vld [vmem:[#allocation10 + $0xe8] ss:$16 sps:$4 sm:$0xff]  }
 0x17b   :  { %v241_v41 = vpack.c.bf16 %v240_v40, %v239_v39  ;;  %v1743_v38 = vld [vmem:[#allocation10 + $0x108] ss:$16 sps:$4 sm:$0xff]   ;;  %v1751_v39 = vld [vmem:[#allocation10 + $0x12c] ss:$16 sps:$4 sm:$0xff]  }
 0x17c   :  { %v1749_v40 = vld [vmem:[#allocation10 + $0x128] ss:$16 sps:$4 sm:$0xff]  }
 0x17d   :  { %1631 = vmatmul.mubr.bf16.vlgmr.msra.gmra.mrb[0].mxu1 %v241_v41  ;;  %v1757_v41 = vld [vmem:[#allocation10 + $0x14c] ss:$16 sps:$4 sm:$0xff]  }
 0x17e   :  { %929 = vmatpush1.bf16.msra.mxu1 %v1692_v47  ;;  %v1772_v47 = vld [vmem:[#allocation10 + $0x1a4] ss:$16 sps:$4 sm:$0xff]  }
 0x17f   :  { %930 = vmatprep.subr.bf16.mxu1 %v1700_v50  ;;  %v1773_v50 = vld [vmem:[#allocation10 + $0x1a8] ss:$16 sps:$4 sm:$0xff]  }
 0x182   :  { %931 = vmatpush1.bf16.msra.mxu1 %v1698_v51  ;;  %v1778_v51 = vld [vmem:[#allocation10 + $0x1c4] ss:$16 sps:$4 sm:$0xff]  }
 0x183   :  { %932 = vmatprep.subr.bf16.mxu1 %v1706_v52  ;;  %v1781_v52 = vld [vmem:[#allocation10 + $0x1cc] ss:$16 sps:$4 sm:$0xff]  }
 0x186   :  { %933 = vmatpush1.bf16.msra.mxu1 %v1704_v53  ;;  %v1776_v53 = vld [vmem:[#allocation10 + $0x1c0] ss:$16 sps:$4 sm:$0xff]  }
 0x187   :  { %934 = vmatprep.subr.bf16.mxu1 %v1712_v54  ;;  %v1779_v54 = vld [vmem:[#allocation10 + $0x1c8] ss:$16 sps:$4 sm:$0xff]  }
 0x18a   :  { %935 = vmatpush1.bf16.msra.mxu1 %v1710_v55  ;;  %v1784_v55 = vld [vmem:[#allocation10 + $0x1e4] ss:$16 sps:$4 sm:$0xff]  }
 0x18b   :  { %936 = vmatprep.subr.bf16.mxu1 %v1718_v56  ;;  %v1787_v56 = vld [vmem:[#allocation10 + $0x1ec] ss:$16 sps:$4 sm:$0xff]  }
 0x18e   :  { %937 = vmatpush1.bf16.msra.mxu1 %v1716_v57  ;;  %v1782_v57 = vld [vmem:[#allocation10 + $0x1e0] ss:$16 sps:$4 sm:$0xff]  }
 0x18f   :  { %938 = vmatprep.subr.bf16.mxu1 %v1724_v58  ;;  %v1785_v58 = vld [vmem:[#allocation10 + $0x1e8] ss:$16 sps:$4 sm:$0xff]  }
 0x192   :  { %939 = vmatpush1.bf16.msra.mxu1 %v1722_v59  ;;  %v1788_v59 = vld [vmem:[#allocation11 + $0x40] sm:$0xff]  }
 0x193   :  { %940 = vmatprep.subr.bf16.mxu1 %v1730_v60  ;;  %v1789_v60 = vld [vmem:[#allocation11 + $0xc0] sm:$0xff]  }
 0x196   :  { %941 = vmatpush1.bf16.msra.mxu1 %v1728_v61  ;;  %v374_v61 = vlaneseq }
 0x197   :  { %942 = vmatprep.subr.bf16.mxu1 %v1736_v62 }
 0x198   :  { %v2183_v62 = vshrl.u32 %v374_v61, 7 }
 0x19a   :  { %943 = vmatpush1.bf16.msra.mxu1 %v1734_v63  ;;  %v376_v63 = vsub.s32 0, %v2183_v62 }
 0x19b   :  { %944 = vmatprep.subr.bf16.mxu1 %v1742_v0  ;;  %v372_v0 = vld [vmem:[#allocation13 + $0x2] ss:$8 sm:$0x3] }
 0x19e   :  { %945 = vmatpush1.bf16.msra.mxu1 %v1740_v1  ;;  %v380_v1 = vsub.s32 1, %v2183_v62 }
 0x19f   :  { %946 = vmatprep.subr.bf16.mxu1 %v1748_v2  ;;  %v377_v2 = vrot.slane %v372_v0, %v376_v63 }
 0x1a2   :  { %947 = vmatpush1.bf16.msra.mxu1 %v1746_v3  ;;  %v381_v3 = vrot.slane %v372_v0, %v380_v1 }
 0x1a3   :  { %948 = vmatprep.subr.bf16.mxu1 %v1754_v4 }
 0x1a6   :  { %949 = vmatpush1.bf16.msra.mxu1 %v1752_v5 }
 0x1a7   :  { %950 = vmatprep.subr.bf16.mxu1 %v1760_v6 }
 0x1aa   :  { %951 = vmatpush1.bf16.msra.mxu1 %v1758_v7 }
 0x1ab   :  { %952 = vmatprep.subr.bf16.mxu1 %v1766_v8 }
 0x1ae   :  { %953 = vmatpush1.bf16.msra.mxu1 %v1764_v9 }
 0x1af   :  { %954 = vmatprep.subr.bf16.mxu1 %v1772_v47  ;;  %v1815_v47 = vld [vmem:[#allocation11 + $0xb0] sm:$0xff]  }
 0x1b2   :  { %955 = vmatpush1.bf16.msra.mxu1 %v1770_v49  ;;  %v1817_v49 = vld [vmem:[#allocation11 + $0xf8] sm:$0xff]  }
 0x1b3   :  { %956 = vmatprep.subr.bf16.mxu1 %v1778_v51  ;;  %v1819_v51 = vld [vmem:[#allocation11 + $0xb8] sm:$0xff]  }
 0x1b6   :  { %957 = vmatpush1.bf16.msra.mxu1 %v1776_v53  ;;  %v586_v53 = vld [vmem:[#allocation13 + $0x3] ss:$8 sm:$0xf] }
 0x1b7   :  { %958 = vmatprep.subr.bf16.mxu1 %v1784_v55  ;;  %v591_v55 = vrot.slane %v586_v53, %v376_v63 }
 0x1ba   :  { %959 = vmatpush1.bf16.msra.mxu1 %v1782_v57  ;;  %v595_v57 = vrot.slane %v586_v53, %v380_v1 }
 0x1bb   :  { %1550 = vmatprep.subr.bf16.mxu1 %v1788_v59 }
 0x250   :  { %v341_v11 = vpop.f32.mrb[0].mxu1 }
 0x251   :  { %v342_v12 = vadd.f32 %v341_v11, %v258_v10  ;;  %v1632_v13 = vpop.f32.mrb[1].mxu1 }
 0x252   :  { %v344_v14 = vpop.f32.mrb[2].mxu1 }
 0x253   :  { %v350_v15 = vmul.f32 0.01, %v342_v12  ;;  %v345_v16 = vadd.f32 %v344_v14, %v258_v10  ;;  %v1633_v17 = vpop.f32.mrb[3].mxu1  ;;  %vm348_vm3 = vcmp.gt.f32.partialorder %v342_v12, 0.0 }
 0x255   :  { %vm349_vm4 = vcmp.gt.f32.partialorder %v345_v16, 0.0  ;;  %v351_v18 = vmul.f32 0.01, %v345_v16  ;;  %v352_v19 = vsel %vm348_vm3, %v342_v12, %v350_v15 }
 0x257   :  { %v353_v20 = vsel %vm349_vm4, %v345_v16, %v351_v18 }
 0x258   :  { %v354_v22 = vpack.c.bf16 %v353_v20, %v352_v19 }
 0x25a   :  { %497 = vmatmul.mubr.bf16.vlgmr.msra.gmra.mrb[4].mxu0 %v354_v22  ;;  %v1790_v22 = vld [vmem:[#allocation11] sm:$0xff]  }
 0x25b   :  { %972 = vmatpush1.bf16.msra.mxu0 %v1695_v21 }
 0x25c   :  { %973 = vmatprep.subr.bf16.mxu0 %v1703_v23  ;;  %v1791_v23 = vld [vmem:[#allocation11 + $0x80] sm:$0xff]  }
 0x25f   :  { %974 = vmatpush1.bf16.msra.mxu0 %v1701_v24  ;;  %v1792_v24 = vld [vmem:[#allocation11 + $0x48] sm:$0xff]  }
 0x260   :  { %975 = vmatprep.subr.bf16.mxu0 %v1709_v25  ;;  %v1793_v25 = vld [vmem:[#allocation11 + $0xc8] sm:$0xff]  }
 0x263   :  { %976 = vmatpush1.bf16.msra.mxu0 %v1707_v26  ;;  %v1794_v26 = vld [vmem:[#allocation11 + $0x8] sm:$0xff]  }
 0x264   :  { %977 = vmatprep.subr.bf16.mxu0 %v1715_v27  ;;  %v1795_v27 = vld [vmem:[#allocation11 + $0x88] sm:$0xff]  }
 0x267   :  { %978 = vmatpush1.bf16.msra.mxu0 %v1713_v28  ;;  %v1796_v28 = vld [vmem:[#allocation11 + $0x50] sm:$0xff]  }
 0x268   :  { %979 = vmatprep.subr.bf16.mxu0 %v1721_v29  ;;  %v1797_v29 = vld [vmem:[#allocation11 + $0xd0] sm:$0xff]  }
 0x26b   :  { %980 = vmatpush1.bf16.msra.mxu0 %v1719_v30  ;;  %v1798_v30 = vld [vmem:[#allocation11 + $0x10] sm:$0xff]  }
 0x26c   :  { %981 = vmatprep.subr.bf16.mxu0 %v1727_v31  ;;  %v1799_v31 = vld [vmem:[#allocation11 + $0x90] sm:$0xff]  }
 0x26f   :  { %982 = vmatpush1.bf16.msra.mxu0 %v1725_v32  ;;  %v1800_v32 = vld [vmem:[#allocation11 + $0x58] sm:$0xff]  }
 0x270   :  { %983 = vmatprep.subr.bf16.mxu0 %v1733_v33  ;;  %v1801_v33 = vld [vmem:[#allocation11 + $0xd8] sm:$0xff]  }
 0x273   :  { %984 = vmatpush1.bf16.msra.mxu0 %v1731_v34  ;;  %v1802_v34 = vld [vmem:[#allocation11 + $0x18] sm:$0xff]  }
 0x274   :  { %985 = vmatprep.subr.bf16.mxu0 %v1739_v35  ;;  %v1803_v35 = vld [vmem:[#allocation11 + $0x98] sm:$0xff]  }
 0x277   :  { %986 = vmatpush1.bf16.msra.mxu0 %v1737_v36  ;;  %v1804_v36 = vld [vmem:[#allocation11 + $0x60] sm:$0xff]  }
 0x278   :  { %987 = vmatprep.subr.bf16.mxu0 %v1745_v37  ;;  %v1805_v37 = vld [vmem:[#allocation11 + $0xe0] sm:$0xff]  }
 0x27b   :  { %988 = vmatpush1.bf16.msra.mxu0 %v1743_v38  ;;  %v1806_v38 = vld [vmem:[#allocation11 + $0x20] sm:$0xff]  }
 0x27c   :  { %989 = vmatprep.subr.bf16.mxu0 %v1751_v39  ;;  %v1807_v39 = vld [vmem:[#allocation11 + $0xa0] sm:$0xff]  }
 0x27f   :  { %990 = vmatpush1.bf16.msra.mxu0 %v1749_v40  ;;  %v1808_v40 = vld [vmem:[#allocation11 + $0x68] sm:$0xff]  }
 0x280   :  { %991 = vmatprep.subr.bf16.mxu0 %v1757_v41  ;;  %v1809_v41 = vld [vmem:[#allocation11 + $0xe8] sm:$0xff]  }
 0x283   :  { %992 = vmatpush1.bf16.msra.mxu0 %v1755_v42  ;;  %v1810_v42 = vld [vmem:[#allocation11 + $0x28] sm:$0xff]  }
 0x284   :  { %993 = vmatprep.subr.bf16.mxu0 %v1763_v43  ;;  %v1811_v43 = vld [vmem:[#allocation11 + $0xa8] sm:$0xff]  }
 0x287   :  { %994 = vmatpush1.bf16.msra.mxu0 %v1761_v44  ;;  %v1812_v44 = vld [vmem:[#allocation11 + $0x70] sm:$0xff]  }
 0x288   :  { %995 = vmatprep.subr.bf16.mxu0 %v1769_v45  ;;  %v1813_v45 = vld [vmem:[#allocation11 + $0xf0] sm:$0xff]  }
 0x28b   :  { %996 = vmatpush1.bf16.msra.mxu0 %v1767_v46  ;;  %v1814_v46 = vld [vmem:[#allocation11 + $0x30] sm:$0xff]  }
 0x28c   :  { %997 = vmatprep.subr.bf16.mxu0 %v1775_v48  ;;  %v1816_v48 = vld [vmem:[#allocation11 + $0x78] sm:$0xff]  }
 0x28f   :  { %998 = vmatpush1.bf16.msra.mxu0 %v1773_v50  ;;  %v1818_v50 = vld [vmem:[#allocation11 + $0x38] sm:$0xff]  }
 0x290   :  { %999 = vmatprep.subr.bf16.mxu0 %v1781_v52  ;;  %v598_v52 = vsub.s32 2, %v2183_v62 }
 0x293   :  { %1000 = vmatpush1.bf16.msra.mxu0 %v1779_v54  ;;  %v602_v54 = vsub.s32 3, %v2183_v62 }
 0x294   :  { %1001 = vmatprep.subr.bf16.mxu0 %v1787_v56  ;;  %v599_v56 = vrot.slane %v586_v53, %v598_v52 }
 0x297   :  { %1002 = vmatpush1.bf16.msra.mxu0 %v1785_v58  ;;  %v603_v58 = vrot.slane %v586_v53, %v602_v54 }
 0x298   :  { %1572 = vmatprep.subr.bf16.mxu0 %v1789_v60 }
 0x32d   :  { %v498_v4 = vpop.f32.mrb[4].mxu0 }
 0x32e   :  { %v499_v5 = vadd.f32 %v498_v4, %v377_v2  ;;  %v500_v6 = vpop.f32.mrb[5].mxu0 }
 0x32f   :  { %v501_v7 = vadd.f32 %v500_v6, %v381_v3  ;;  %v502_v8 = vpop.f32.mrb[6].mxu0 }
 0x330   :  { %v511_v9 = vmul.f32 0.01, %v499_v5  ;;  %v503_v10 = vadd.f32 %v502_v8, %v377_v2  ;;  %v504_v11 = vpop.f32.mrb[7].mxu0  ;;  %vm507_vm5 = vcmp.gt.f32.partialorder %v499_v5, 0.0 }
 0x331   :  { %v512_v12 = vmul.f32 0.01, %v501_v7  ;;  %v505_v13 = vadd.f32 %v504_v11, %v381_v3  ;;  %vm508_vm6 = vcmp.gt.f32.partialorder %v501_v7, 0.0 }
 0x332   :  { %vm509_vm7 = vcmp.gt.f32.partialorder %v503_v10, 0.0  ;;  %v513_v14 = vmul.f32 0.01, %v503_v10  ;;  %v515_v16 = vsel %vm507_vm5, %v499_v5, %v511_v9 }
 0x333   :  { %vm510_vm8 = vcmp.gt.f32.partialorder %v505_v13, 0.0  ;;  %v514_v15 = vmul.f32 0.01, %v505_v13  ;;  %v516_v19 = vsel %vm508_vm6, %v501_v7, %v512_v12 }
 0x334   :  { %v517_v17 = vsel %vm509_vm7, %v503_v10, %v513_v14 }
 0x335   :  { %v519_v18 = vpack.c.bf16 %v517_v17, %v515_v16  ;;  %v518_v20 = vsel %vm510_vm8, %v505_v13, %v514_v15 }
 0x336   :  { %v520_v21 = vpack.c.bf16 %v518_v20, %v516_v19 }
 0x338   :  { %960 = vmatprep.mubr.bf16.mxu1 %v520_v21  ;;  %1003 = vmatprep.mubr.bf16.mxu0 %v520_v21 }
 0x339   :  { %961 = vmatmul.mubr.bf16.vlgmr.msra.gmra.mrb[4].mxu1 %v519_v18  ;;  %1004 = vmatmul.mubr.bf16.vlgmr.msra.gmra.mrb[8].mxu0 %v519_v18 }
 0x33a   :  { %1551 = vmatpush3.bf16.msra.mxu1 %v1790_v22  ;;  %1573 = vmatpush3.bf16.msra.mxu0 %v1791_v23 }
 0x33b   :  { %1552 = vmatprep.subr.bf16.mxu1 %v1792_v24  ;;  %1574 = vmatprep.subr.bf16.mxu0 %v1793_v25 }
 0x33e   :  { %1553 = vmatpush3.bf16.msra.mxu1 %v1794_v26  ;;  %1575 = vmatpush3.bf16.msra.mxu0 %v1795_v27 }
 0x33f   :  { %1554 = vmatprep.subr.bf16.mxu1 %v1796_v28  ;;  %1576 = vmatprep.subr.bf16.mxu0 %v1797_v29 }
 0x342   :  { %1555 = vmatpush3.bf16.msra.mxu1 %v1798_v30  ;;  %1577 = vmatpush3.bf16.msra.mxu0 %v1799_v31 }
 0x343   :  { %1556 = vmatprep.subr.bf16.mxu1 %v1800_v32  ;;  %1578 = vmatprep.subr.bf16.mxu0 %v1801_v33  ;;  %v1106_v33 = vld [vmem:[#allocation13 + $0x4] ss:$0 sm:$0xff] }
 0x346   :  { %1557 = vmatpush3.bf16.msra.mxu1 %v1802_v34  ;;  %1579 = vmatpush3.bf16.msra.mxu0 %v1803_v35 }
 0x347   :  { %1558 = vmatprep.subr.bf16.mxu1 %v1804_v36  ;;  %1580 = vmatprep.subr.bf16.mxu0 %v1805_v37 }
 0x34a   :  { %1559 = vmatpush3.bf16.msra.mxu1 %v1806_v38  ;;  %1581 = vmatpush3.bf16.msra.mxu0 %v1807_v39 }
 0x34b   :  { %1560 = vmatprep.subr.bf16.mxu1 %v1808_v40  ;;  %1582 = vmatprep.subr.bf16.mxu0 %v1809_v41 }
 0x34e   :  { %1561 = vmatpush3.bf16.msra.mxu1 %v1810_v42  ;;  %1583 = vmatpush3.bf16.msra.mxu0 %v1811_v43 }
 0x34f   :  { %1562 = vmatprep.subr.bf16.mxu1 %v1812_v44  ;;  %1584 = vmatprep.subr.bf16.mxu0 %v1813_v45 }
 0x352   :  { %1563 = vmatpush3.bf16.msra.mxu1 %v1814_v46  ;;  %1585 = vmatpush3.bf16.msra.mxu0 %v1815_v47 }
 0x353   :  { %1564 = vmatprep.subr.bf16.mxu1 %v1816_v48  ;;  %1586 = vmatprep.subr.bf16.mxu0 %v1817_v49 }
 0x356   :  { %1565 = vmatpush3.bf16.msra.mxu1 %v1818_v50  ;;  %1587 = vmatpush3.bf16.msra.mxu0 %v1819_v51 }
 0x40c   :  { %v962_v59 = vpop.f32.mrb[4].mxu1  ;;  %v1005_v60 = vpop.f32.mrb[8].mxu0 }
 0x40d   :  { %v963_v61 = vadd.f32 %v962_v59, %v591_v55  ;;  %v1006_v0 = vadd.f32 %v1005_v60, %v599_v56  ;;  %v964_v2 = vpop.f32.mrb[5].mxu1  ;;  %v1007_v3 = vpop.f32.mrb[9].mxu0 }
 0x40e   :  { %v965_v4 = vadd.f32 %v964_v2, %v595_v57  ;;  %v1008_v5 = vadd.f32 %v1007_v3, %v603_v58  ;;  %v966_v6 = vpop.f32.mrb[6].mxu1  ;;  %v1009_v7 = vpop.f32.mrb[10].mxu0 }
 0x40f   :  { %vm1014_vm9 = vcmp.gt.f32.partialorder %v963_v61, 0.0  ;;  %v1022_v8 = vmul.f32 0.01, %v963_v61  ;;  %vm1016_vm10 = vcmp.gt.f32.partialorder %v1006_v0, 0.0  ;;  %v1024_v9 = vmul.f32 0.01, %v1006_v0 }
 0x410   :  { %vm1015_vm11 = vcmp.gt.f32.partialorder %v965_v4, 0.0  ;;  %v1023_v63 = vmul.f32 0.01, %v965_v4  ;;  %vm1017_vm12 = vcmp.gt.f32.partialorder %v1008_v5, 0.0  ;;  %v1025_v62 = vmul.f32 0.01, %v1008_v5 }
 0x411   :  { %v967_v1 = vadd.f32 %v966_v6, %v591_v55  ;;  %v1010_v10 = vadd.f32 %v1009_v7, %v599_v56  ;;  %v968_v11 = vpop.f32.mrb[7].mxu1  ;;  %v1011_v12 = vpop.f32.mrb[11].mxu0  ;;  %v1030_v13 = vsel %vm1014_vm9, %v963_v61, %v1022_v8  ;;  %v1032_v14 = vsel %vm1016_vm10, %v1006_v0, %v1024_v9 }
 0x412   :  { %v969_v15 = vadd.f32 %v968_v11, %v595_v57  ;;  %v1012_v16 = vadd.f32 %v1011_v12, %v603_v58  ;;  %v1031_v23 = vsel %vm1015_vm11, %v965_v4, %v1023_v63  ;;  %v1033_v24 = vsel %vm1017_vm12, %v1008_v5, %v1025_v62 }
 0x413   :  { %vm1018_vm13 = vcmp.gt.f32.partialorder %v967_v1, 0.0  ;;  %v1026_v17 = vmul.f32 0.01, %v967_v1  ;;  %vm1020_vm14 = vcmp.gt.f32.partialorder %v1010_v10, 0.0  ;;  %v1028_v18 = vmul.f32 0.01, %v1010_v10 }
 0x414   :  { %vm1019_vm15 = vcmp.gt.f32.partialorder %v969_v15, 0.0  ;;  %v1027_v19 = vmul.f32 0.01, %v969_v15  ;;  %vm1021_vm0 = vcmp.gt.f32.partialorder %v1012_v16, 0.0  ;;  %v1029_v20 = vmul.f32 0.01, %v1012_v16 }
 0x415   :  { %v1034_v21 = vsel %vm1018_vm13, %v967_v1, %v1026_v17  ;;  %v1036_v22 = vsel %vm1020_vm14, %v1010_v10, %v1028_v18 }
 0x416   :  { %v1038_v25 = vpack.c.bf16 %v1034_v21, %v1030_v13  ;;  %v1040_v26 = vpack.c.bf16 %v1036_v22, %v1032_v14  ;;  %v1035_v27 = vsel %vm1019_vm15, %v969_v15, %v1027_v19  ;;  %v1037_v28 = vsel %vm1021_vm0, %v1012_v16, %v1029_v20 }
 0x417   :  { %v1039_v29 = vpack.c.bf16 %v1035_v27, %v1031_v23  ;;  %v1041_v30 = vpack.c.bf16 %v1037_v28, %v1033_v24 }
 0x419   :  { %1331 = vmatprep.mubr.bf16.mxu1 %v1039_v29  ;;  %1372 = vmatprep.mubr.bf16.mxu0 %v1041_v30 }
 0x41a   :  { %1332 = vmatmul.mubr.bf16.vlgmr.msra.gmra.mrb[8].mxu1 %v1038_v25  ;;  %1373 = vmatmul.mubr.bf16.vlgmr.msra.gmra.mrb[12].mxu0 %v1040_v26 }
 0x4ed   :  { %v1566_v31 = vpop.f32.mrb[8].mxu1  ;;  %v1588_v32 = vpop.f32.mrb[12].mxu0 }
 0x4ee   :  { %v1567_v34 = vpop.f32.mrb[9].mxu1  ;;  %v1589_v35 = vpop.f32.mrb[13].mxu0 }
 0x4ef   :  { %v1568_v36 = vadd.f32 %v1567_v34, %v1566_v31  ;;  %v1590_v37 = vadd.f32 %v1589_v35, %v1588_v32  ;;  %v1569_v38 = vpop.f32.mrb[10].mxu1  ;;  %v1591_v39 = vpop.f32.mrb[14].mxu0 }
 0x4f0   :  { %v1570_v40 = vpop.f32.mrb[11].mxu1  ;;  %v1592_v41 = vpop.f32.mrb[15].mxu0 }
 0x4f1   :  { %v1334_v42 = vadd.f32 %v1568_v36, %v1106_v33  ;;  %v1571_v43 = vadd.f32 %v1570_v40, %v1569_v38  ;;  %v1593_v44 = vadd.f32 %v1592_v41, %v1591_v39 }
 0x4f3   :  { %v1375_v45 = vadd.f32 %v1590_v37, %v1334_v42  ;;  %v1337_v46 = vadd.f32 %v1571_v43, %v1106_v33 }
 0x4f5   :  { %1381 = vst [vmem:[#allocation14] sm:$0xff] %v1375_v45  ;;  %v1378_v47 = vadd.f32 %v1593_v44, %v1337_v46 }
 0x4f7   :  { %1382 = vst [vmem:[#allocation14 + $0x8] sm:$0xff] %v1378_v47 }
 0x4f8   :  { %1985 = shalt.err (!%p1982_p4)
}
 0x4f9   :  { %s1986_s22 = scalar_lea.hbm %s2221_s7, 256 }
 0x4fa   :  { %p1987_p5 = scmp.ne.s32.totalorder %s2221_s7, %s1986_s22  ;;  %p1990_p6 = scmp.lt.u32.totalorder %s1986_s22, %s2221_s7 }
 0x4fc   :  { %p1992_p7 = pnand %p1990_p6, %p1987_p5 }
 0x4fe   :  { %1995 = shalt.err (!%p1992_p7)
}
 0x4ff   :  { %1394 = dma.vmem_to_hbm [thread:$0]  %s1389_s0, 256, %s2221_s7, [#allocation4], %s2010_s1, %s2010_s1, %s2011_s25  }
 0x500   :  { %2004 = dma.done.wait [#allocation4], 256  }
 0x501   :  { %2005 = vsyncadd [#allocation4], 4294967040 }
 0x502   :  { %1398 = vsyncpa [#allocation3], 1 }
 0x503   :  { %1399 = vsyncpa [#allocation6], 1 }
 0x504   :  { %1400 = vsyncpa [#allocation9], 1 }
 0x505   :  { %1401 = vsyncpa [#allocation12], 1 }
 0x506   :  { %1402 = vsyncpa [#allocation4], 1 }

</bundles_post_ra>
